<compile_context>
chip_gen: v5e
topology: v5e:2x2
jax: 0.10.0
libtpu: 0.0.40
codegen_flags: <defaults>
</compile_context>

<pallas_src>
import functools

import jax
import jax.numpy as jnp
from jax.experimental import pallas as pl
from jax.experimental.pallas import tpu as pltpu


def _conv_bn_relu_kernel(x_ref, w_ref, shift_ref, o_ref, col_ref, *, K, C_in, L):
    """Fused Conv1d('same') + BN(eval) + ReLU for one batch element (NCL layout).

    x_ref:     (1, C_in, L + K - 1)  zero-padded input window (VMEM)
    w_ref:     (C_out, K*C_in)       BN-scale-folded weights; col k*C_in+i = w[o,i,k]
    shift_ref: (C_out, 1)            folded BN shift = beta - mean * scale
    o_ref:     (1, C_out, L)         output (NCL)
    col_ref:   (K*C_in, L)           VMEM scratch: im2col slab
    """
    # Build the im2col slab: row block k holds x[:, l + k] for l in [0, L)
    # (the 'same' zero padding is already baked into the padded input window,
    # so no boundary masks are needed).
    for k in range(K):  # K is tiny and static -> unrolled
        col_ref[k * C_in:(k + 1) * C_in, :] = x_ref[0, :, pl.ds(k, L)]
    # Single MXU matmul, contraction depth K*C_in, f32 accumulation.
    y = jnp.dot(w_ref[...], col_ref[...], preferred_element_type=jnp.float32)
    y = y + shift_ref[...]                     # lane-broadcast BN shift (f32)
    o_ref[0] = jnp.maximum(y, 0.0).astype(o_ref.dtype)


@functools.partial(jax.jit, static_argnames=("compute_dtype",))
def simple_cnn1layer_forward(x_ncl, weight, gamma, beta, running_mean,
                             running_var, eps=1e-5, *,
                             compute_dtype=jnp.float32):
    """x_ncl: (N, C_in, L) float32 (PyTorch NCL). Returns (N, C_out, L), dtype of x."""
    N, C_in, L = x_ncl.shape
    C_out, C_in_w, K = weight.shape
    assert C_in_w == C_in

    # PyTorch 'same' padding (stride=1): left = (K-1)//2, right = (K-1) - left.
    pad_l = (K - 1) // 2
    pad_r = (K - 1) - pad_l
    Lp = L + K - 1

    # Fold eval-mode BN scale into the conv taps (parameter-sized, trace-time).
    scale = (gamma / jnp.sqrt(running_var + eps)).astype(jnp.float32)
    shift = (beta - running_mean * scale).astype(jnp.float32)
    w_folded = weight.astype(jnp.float32) * scale[:, None, None]      # (C_out, C_in, K)
    # Column ordering k*C_in + i matches the im2col row ordering in the kernel.
    w_cat = jnp.transpose(w_folded, (0, 2, 1)).reshape(C_out, K * C_in)
    w_cat = w_cat.astype(compute_dtype)
    shift_col = shift.reshape(C_out, 1)

    # Tiny (K-1)-column zero pad so the kernel's K window loads need no masking.
    x_pad = jnp.pad(x_ncl, ((0, 0), (0, 0), (pad_l, pad_r))).astype(compute_dtype)

    kernel = functools.partial(_conv_bn_relu_kernel, K=K, C_in=C_in, L=L)
    return pl.pallas_call(
        kernel,
        out_shape=jax.ShapeDtypeStruct((N, C_out, L), x_ncl.dtype),
        grid=(N,),
        in_specs=[
            pl.BlockSpec((1, C_in, Lp), lambda n: (n, 0, 0)),      # x (one sample)
            pl.BlockSpec((C_out, K * C_in), lambda n: (0, 0)),     # folded weights
            pl.BlockSpec((C_out, 1), lambda n: (0, 0)),            # BN shift column
        ],
        out_specs=pl.BlockSpec((1, C_out, L), lambda n: (n, 0, 0)),
        scratch_shapes=[pltpu.VMEM((K * C_in, L), compute_dtype)],
        compiler_params=pltpu.CompilerParams(
            dimension_semantics=("parallel",)),
    )(x_pad, w_cat, shift_col)


if __name__ == "__main__":
    # Small shapes consistent with the module: batch=2, in_channels=4,
    # out_channels=8, kernel_size=3, sequence length=16.
    N, C_in, C_out, K, L = 2, 4, 8, 3, 16

    key = jax.random.PRNGKey(0)
    k_x, k_w, k_g, k_b, k_m, k_v = jax.random.split(key, 6)

    x = jax.random.normal(k_x, (N, C_in, L), dtype=jnp.float32)
    weight = jax.random.normal(k_w, (C_out, C_in, K), dtype=jnp.float32) * 0.1
    gamma = 1.0 + 0.1 * jax.random.normal(k_g, (C_out,), dtype=jnp.float32)
    beta = 0.1 * jax.random.normal(k_b, (C_out,), dtype=jnp.float32)
    running_mean = 0.05 * jax.random.normal(k_m, (C_out,), dtype=jnp.float32)
    running_var = jnp.abs(
        1.0 + 0.1 * jax.random.normal(k_v, (C_out,), dtype=jnp.float32))

    out = simple_cnn1layer_forward(x, weight, gamma, beta, running_mean,
                                   running_var)
    jax.block_until_ready(out)

    # Pure-JAX eval-mode reference (same math as the PyTorch module in eval()).
    pad_l = (K - 1) // 2
    pad_r = (K - 1) - pad_l
    ref = jax.lax.conv_general_dilated(
        x, weight, window_strides=(1,), padding=[(pad_l, pad_r)],
        dimension_numbers=("NCH", "OIH", "NCH"))
    scale = gamma / jnp.sqrt(running_var + 1e-5)
    shift = beta - running_mean * scale
    ref = jnp.maximum(ref * scale[None, :, None] + shift[None, :, None], 0.0)

    assert out.shape == (N, C_out, L)
    assert jnp.allclose(out, ref, atol=1e-4, rtol=1e-4), (
        float(jnp.max(jnp.abs(out - ref))))
    print("KERNEL_OK")
</pallas_src>

<mosaic_0001>
module attributes {stable_mosaic.version = 11 : i64} {
  func.func @_conv_bn_relu_kernel(%arg0: i32, %arg1: memref<1x4x18xf32, #tpu.memory_space<vmem>>, %arg2: memref<8x12xf32, #tpu.memory_space<vmem>>, %arg3: memref<8x1xf32, #tpu.memory_space<vmem>>, %arg4: memref<1x8x16xf32, #tpu.memory_space<vmem>>, %arg5: memref<12x16xf32, #tpu.memory_space<vmem>>) attributes {dimension_semantics = [#tpu.dimension_semantics<parallel>], iteration_bounds = array<i64: 2>, scalar_prefetch = 0 : i64, scratch_operands = 1 : i64, tpu.core_type = #tpu.core_type<tc>, window_params = [{transform_indices = @transform_0, window_bounds = array<i64: 1, 4, 18>}, {pipeline_mode = #tpu.pipeline_mode<synchronous>, transform_indices = @transform_1, window_bounds = array<i64: 8, 12>}, {pipeline_mode = #tpu.pipeline_mode<synchronous>, transform_indices = @transform_2, window_bounds = array<i64: 8, 1>}, {transform_indices = @transform_3, window_bounds = array<i64: 1, 8, 16>}]} {
    %c0 = arith.constant 0 : index
    %c0_0 = arith.constant 0 : index
    %c0_1 = arith.constant 0 : index
    %0 = vector.load %arg1[%c0, %c0_0, %c0_1] : memref<1x4x18xf32, #tpu.memory_space<vmem>>, vector<1x4x16xf32>
    %1 = vector.shape_cast %0 : vector<1x4x16xf32> to vector<4x16xf32>
    %c0_2 = arith.constant 0 : index
    %c0_3 = arith.constant 0 : index
    %2 = vector.load %arg5[%c0_2, %c0_3] : memref<12x16xf32, #tpu.memory_space<vmem>>, vector<4x16xf32>
    tpu.vector_store %arg5[%c0_2, %c0_3], %1 {strides = array<i32>} : memref<12x16xf32, #tpu.memory_space<vmem>>, vector<4x16xf32>,
    %c0_4 = arith.constant 0 : index
    %c0_5 = arith.constant 0 : index
    %c1 = arith.constant 1 : index
    %3 = vector.load %arg1[%c0_4, %c0_5, %c1] : memref<1x4x18xf32, #tpu.memory_space<vmem>>, vector<1x4x16xf32>
    %4 = vector.shape_cast %3 : vector<1x4x16xf32> to vector<4x16xf32>
    %c4 = arith.constant 4 : index
    %c0_6 = arith.constant 0 : index
    %5 = vector.load %arg5[%c4, %c0_6] : memref<12x16xf32, #tpu.memory_space<vmem>>, vector<4x16xf32>
    tpu.vector_store %arg5[%c4, %c0_6], %4 {strides = array<i32>} : memref<12x16xf32, #tpu.memory_space<vmem>>, vector<4x16xf32>,
    %c0_7 = arith.constant 0 : index
    %c0_8 = arith.constant 0 : index
    %c2 = arith.constant 2 : index
    %6 = vector.load %arg1[%c0_7, %c0_8, %c2] : memref<1x4x18xf32, #tpu.memory_space<vmem>>, vector<1x4x16xf32>
    %7 = vector.shape_cast %6 : vector<1x4x16xf32> to vector<4x16xf32>
    %c8 = arith.constant 8 : index
    %c0_9 = arith.constant 0 : index
    %8 = vector.load %arg5[%c8, %c0_9] : memref<12x16xf32, #tpu.memory_space<vmem>>, vector<4x16xf32>
    tpu.vector_store %arg5[%c8, %c0_9], %7 {strides = array<i32>} : memref<12x16xf32, #tpu.memory_space<vmem>>, vector<4x16xf32>,
    %c0_10 = arith.constant 0 : index
    %c0_11 = arith.constant 0 : index
    %9 = vector.load %arg2[%c0_10, %c0_11] : memref<8x12xf32, #tpu.memory_space<vmem>>, vector<8x12xf32>
    %c0_12 = arith.constant 0 : index
    %c0_13 = arith.constant 0 : index
    %10 = vector.load %arg5[%c0_12, %c0_13] : memref<12x16xf32, #tpu.memory_space<vmem>>, vector<12x16xf32>
    %cst = arith.constant dense<0.000000e+00> : vector<8x16xf32>
    %11 = tpu.matmul %9, %10, %cst {dimension_numbers = #tpu.dot_dimension_numbers<[1], [0], [0], [1], [0, 0, 1, 1], [], []>} : vector<8x12xf32>, vector<12x16xf32>, vector<8x16xf32> -> vector<8x16xf32>
    %c0_14 = arith.constant 0 : index
    %c0_15 = arith.constant 0 : index
    %12 = vector.load %arg3[%c0_14, %c0_15] : memref<8x1xf32, #tpu.memory_space<vmem>>, vector<8x1xf32>
    %13 = vector.broadcast %12 : vector<8x1xf32> to vector<8x16xf32>
    %14 = arith.addf %11, %13 : vector<8x16xf32>
    %cst_16 = arith.constant 0.000000e+00 : f32
    %15 = vector.broadcast %cst_16 : f32 to vector<8x16xf32>
    %16 = arith.maximumf %14, %15 : vector<8x16xf32>
    %c0_17 = arith.constant 0 : index
    %c0_18 = arith.constant 0 : index
    %c0_19 = arith.constant 0 : index
    %17 = vector.load %arg4[%c0_17, %c0_18, %c0_19] : memref<1x8x16xf32, #tpu.memory_space<vmem>>, vector<1x8x16xf32>
    %18 = vector.shape_cast %17 : vector<1x8x16xf32> to vector<8x16xf32>
    %19 = vector.shape_cast %16 : vector<8x16xf32> to vector<1x8x16xf32>
    tpu.vector_store %arg4[%c0_17, %c0_18, %c0_19], %19 {strides = array<i32>} : memref<1x8x16xf32, #tpu.memory_space<vmem>>, vector<1x8x16xf32>,
    return
  }
  func.func @transform_0(%arg0: i32) -> (i32, i32, i32) {
    %c0_i32 = arith.constant 0 : i32
    %c0_i32_0 = arith.constant 0 : i32
    %c0_i32_1 = arith.constant 0 : i32
    return %arg0, %c0_i32, %c0_i32_0 : i32, i32, i32
  }
  func.func @transform_1(%arg0: i32) -> (i32, i32) {
    %c0_i32 = arith.constant 0 : i32
    %c0_i32_0 = arith.constant 0 : i32
    %c0_i32_1 = arith.constant 0 : i32
    return %c0_i32, %c0_i32_0 : i32, i32
  }
  func.func @transform_2(%arg0: i32) -> (i32, i32) {
    %c0_i32 = arith.constant 0 : i32
    %c0_i32_0 = arith.constant 0 : i32
    %c0_i32_1 = arith.constant 0 : i32
    return %c0_i32, %c0_i32_0 : i32, i32
  }
  func.func @transform_3(%arg0: i32) -> (i32, i32, i32) {
    %c0_i32 = arith.constant 0 : i32
    %c0_i32_0 = arith.constant 0 : i32
    %c0_i32_1 = arith.constant 0 : i32
    return %arg0, %c0_i32, %c0_i32_0 : i32, i32, i32
  }
}

</mosaic_0001>

<bundles_post_ra>
// kernel: simple_cnn1layer_forward.1
= control target key start
LH: loop header
LB: loop body
LE: loop exit
PB: predicated region body
PF: predicated region fallthrough
CT: control target
= control target key end

     0   :  { %8 = vsyncpa [#allocation4], 0  ;;  %s533_s0 = inlined_call_operand.vmem [shape: f32[2,4,18], index: 0, kind: input, shape index: {}]   ;;  %s534_s1 = inlined_call_operand.vmem [shape: f32[8,12], index: 1, kind: input, shape index: {}]   ;;  %s535_s2 = inlined_call_operand.vmem [shape: f32[8,1], index: 2, kind: input, shape index: {}]   ;;  %s536_s3 = inlined_call_operand.hbm [shape: f32[2,8,16], index: 3, kind: output, shape index: {}]  }
   0x1   :  { %10 = vsyncpa [#allocation4 + $0x1], 0  ;;  %s439_s12 = smov 0   ;;  %s441_s13 = smov 0  }
   0x2   :  { %s443_s14 = smov 0   ;;  %s445_s15 = smov 0  }
   0x3 LB: > { %s460_s16 = sadd.s32 4294967295, %s414_s15   ;;  %s296_s17 = sadd.s32 4294967294, %s414_s15   ;;  %s414_s15 = sphi %s445_s15, %s542_s15   ;;  %s410_s14 = sphi %s443_s14, %s541_s14   ;;  %s406_s13 = sphi %s441_s13, %s540_s13   ;;  %s402_s12 = sphi %s439_s12, %s539_s12  }
   0x4   : > { %s464_s18 = sadd.s32 1, %s414_s15   ;;  %s91_s19 = sadd.s32 1, %s410_s14 }
   0x5   : > { %s88_s20 = ssub.s32 %s414_s15, %s464_s18  ;;  %p101_p0 = scmp.ne.s32.totalorder %s410_s14, %s406_s13 }
   0x6   : > { %p89_p1 = scmp.eq.s32.totalorder %s88_s20, 0  ;;  %p102_p2 = scmp.eq.s32.totalorder %s460_s16, 1 }
   0x7   : > { %p107_p3 = scmp.ne.s32.totalorder %s406_s13, %s402_s12  ;;  %p108_p4 = scmp.eq.s32.totalorder %s296_s17, 1 }
   0x8   : > { %s475_s21 = scalar_select %p89_p1, %s410_s14, %s91_s19  }
   0x9   : > { %p477_p5 = por %p102_p2, %p101_p0  ;;  %p481_p6 = por %p108_p4, %p107_p3 }
   0xa   : > { %p299_p7 = scmp.ge.s32.totalorder %s414_s15, 1  ;;  %p139_p8 = scmp.lt.s32.totalorder %s414_s15, 3 }
   0xc   : > { %p140_p9 = pnand %p299_p7, %p139_p8 }
   0xd   : > { %p162_p10 = scmp.lt.s32.totalorder (!%p140_p9), %s460_s16, 1  ;;  %s416_s29 = smov (!%p140_p9), 126  }
   0xe   : > { %143 = sbr.rel (%p140_p9) target bundleno = 289 (0x121), region = 32  ;;  %s417_s30 = smov (!%p140_p9), 127  }
   0xf   : > { %s159_s8 = sand.u32 (!%p140_p9), 1, %s406_s13   ;;  %s305_s10 = sshll.u32 (!%p140_p9), %s460_s16, 3 }
  0x10   : > { %s300_s9 = sshll.u32 (!%p140_p9), %s159_s8, 3  ;;  %s232_s19 = scalar_lea.hbm (!%p140_p9), %s536_s3, %s305_s10 }
  0x11   : > { %s161_s20 = scalar_lea.vmem (!%p140_p9), [#allocation3], %s300_s9  ;;  %s222_s26 = scalar_lea.sflag (!%p140_p9), [#allocation4], %s159_s8 }
  0x13   : > { %s163_s24 = scalar_select %p162_p10, %s460_s16, 1  ;;  %vm167_vm0 = vcmask 125952   ;;  %v184_v3 = vld [vmem:[%s535_s2] sm:$0xff]  ;;  %v418_v4 = vmov 0   ;;  %vm194_vm1 = vcmask 1043456   ;;  %vm190_vm2 = vcmask 97280  }
  0x14   : > { %350 = vset.pattern.permute.xlu1 %v418_v4  ;;  %351 = vset.pattern.permute.xlu0 %v418_v4  ;;  %v181_v8 = vld [vmem:[%s534_s1] sm:$0xff]  ;;  %vm219_vm3 = vcmask 130048  }
  0x15   : > { %s301_s25 = sshll.u32 %s163_s24, 2  ;;  %187 = vperm.xlu1 %350, %v184_v3   ;;  %s234_s24 = sshll.u32 %s161_s20, 4  ;;  %s235_s24 = int_to_ptr.vmem [resolvable:$true] %s234_s24 }
  0x16   : > { %s165_s28 = scalar_lea.vmem %s533_s0, %s301_s25  ;;  %s236_s25 = sshll.u32 %s232_s19, 4  ;;  %s237_s25 = int_to_ptr.hbm [resolvable:$true] %s236_s25 }
  0x17   : > { %v175_v0 = vld [vmem:[%s165_s28] sm:$0xf]  ;;  %s366_s27 = sshra.s32 %s237_s25, 4  ;;  %s367_s27 = int_to_ptr.hbm [resolvable:$true] %s366_s27 }
  0x18   : > { %v166_v1 = vld [vmem:[%s165_s28] sm:$0xf]  ;;  %177 = vrot.lane.b32.xlu0 %v175_v0, %s416_s29  ;;  %s368_s16 = scalar_lea.hbm %s367_s27, 8  ;;  %p373_p0 = scmp.lt.s32.totalorder %s367_s27, %s536_s3 }
  0x19   : > { %168 = vst.msk [vmem:[#allocation2] sm:$0xf] %vm167_vm0, %v166_v1  ;;  %v169_v2 = vld [vmem:[%s165_s28] sm:$0xf]  ;;  %p369_p11 = scmp.ne.s32.totalorder %s367_s27, %s368_s16 }
  0x1b   : > { %p370_p12 = pnand %p369_p11, %p477_p5 }
  0x1d   : > { %p371_p13 = pneg %p370_p12 }
  0x20   : > { %171 = vrot.lane.b32.xlu0 %v169_v2, %s417_s30  ;;  %s372_s30 = scalar_lea.hbm %s536_s3, 16 }
  0x21   : > { %p374_p1 = scmp.lt.s32.totalorder %s372_s30, %s368_s16 }
  0x23   : > { %p375_p2 = por %p374_p1, %p373_p0 }
  0x25   : > { %p376_p3 = pnand %p375_p2, %p371_p13 }
  0x87   : > { %v188_v10 = vpop.permute.xlu1 %187 }
  0x8a   : > { %v178_v5 = vpop.permute.xlu0 %177 }
  0x8b   : > { %180 = vst.msk [vmem:[#allocation2 + $0x8] sm:$0xf] %vm167_vm0, %v178_v5 }
  0x92   : > { %v172_v6 = vpop.permute.xlu0 %171  ;;  %v183_v7 = vld [vmem:[#allocation2 + $0x8] sm:$0xf] }
  0x93   : > { %174 = vst.msk [vmem:[#allocation2 + $0x4] sm:$0xf] %vm167_vm0, %v172_v6  ;;  %302 = vmatpush.msk.msra.mxu0 %vm194_vm1, %v183_v7 }
  0x9a   : > { %v182_v9 = vld [vmem:[#allocation2] sm:$0xff] }
  0x9b   : > { %213 = vmatpush.msra.mxu0 %v182_v9 }
  0x9c   : > { %303 = vmatmul.msk.f32.vlgmr.msra.gmra.mxu0 %vm190_vm2, %v181_v8 }
 0x119   : > { %v215_v11 = vpop.f32.mrf.mxu0 }
 0x11a   : > { %v216_v12 = vadd.f32 %v215_v11, %v188_v10 }
 0x11c   : > { %v218_v13 = vmax.f32 %v216_v12, 0.0 }
 0x11e   : > { %220 = vst.msk [vmem:[%s161_s20] sm:$0xff] %vm219_vm3, %v218_v13 }
 0x11f   : > { %379 = shalt.err (!%p376_p3)
}
 0x120   : > { %308 = dma.vmem_to_hbm [thread:$0]  (%p477_p5), %s235_s24, 128, %s237_s25, %s222_s26  }
 0x121 PF: > { %p314_p4 = scmp.ge.s32.totalorder %s414_s15, 2  ;;  %s248_s6 = sand.u32 1, %s402_s12  }
 0x122   : > { %s249_s7 = scalar_lea.sflag [#allocation4], %s248_s6 }
 0x123   : > { %p311_p7 = pnand %p314_p4, %p481_p6 }
 0x125   : > { %p312_p8 = pneg %p311_p7 }
 0x127   : > { %397 = dma.done.wait (%p312_p8), %s249_s7, 128  }
 0x128   : > { %399 = vsyncadd (%p312_p8), %s249_s7, 4294967168  ;;  %p13_p9 = scmp.ge.s32.totalorder %s464_s18, 4   ;;  %s539_s12 = smov %s406_s13 }
 0x129   : > { %s540_s13 = smov %s410_s14  ;;  %s541_s14 = smov %s475_s21 }
 0x12a   : > { %s542_s15 = smov %s464_s18  ;;  %15 = sbr.rel (!%p13_p9) target bundleno = 3 (0x3), region = 67 }
 0x12f   :  { %255 = vsyncpa [#allocation4], 1 }
 0x130   :  { %257 = vsyncpa [#allocation4 + $0x1], 1 }

</bundles_post_ra>
